<compile_context>
chip_gen: v6e
topology: v6e:2x2x1
jax: 0.10.0
libtpu: 0.0.40
codegen_flags: <defaults>
</compile_context>

<pallas_src>
import numpy as np
import jax
import jax.numpy as jnp
from jax.experimental import pallas as pl
from jax.experimental.pallas import tpu as pltpu

# ---- small synthetic shapes ----
B = 2          # batch
T = 16         # mel t-steps (multiple of 8 -> clean sublane layout)
NMEL = 128     # n_mel (forward asserts == 128)
H = 64         # hidden channels after first conv
U = 4          # upsample factor (real vocoder uses hop_length=441)
H2 = 32        # channels after upsample  (U * H2 == 128 lanes)
S = T * U      # output samples per batch
K = 7          # conv kernel size
PAD = 3        # conv padding

# ---- Config constants (voicefixer vocoder config) ----
MIN_DB = -115.0
MAX_ABS = 4.0
REF_DB = 20.0
LEAKY = 0.2

# normalize(S) = clip(2*MAX_ABS*(S - MIN_DB)/(-MIN_DB) - MAX_ABS, -MAX_ABS, MAX_ABS)
#              = clip(NORM_A * S + NORM_B, -MAX_ABS, MAX_ABS)   (constant-folded)
NORM_A = -2.0 * MAX_ABS / MIN_DB
NORM_B = MAX_ABS
MIN_LEVEL = 10.0 ** (MIN_DB / 20.0)      # amp_to_db floor


def _leaky(x):
    # LeakyReLU(0.2) == max(x, 0.2*x) for positive slope < 1
    return jnp.maximum(x, LEAKY * x)


def vocoder_kernel(mel_ref, melw_ref, w1_ref, b1_ref, wup_ref, bup_ref,
                   w2_ref, bout_ref, out_ref):
    # ---- preprocessing: mel / weight, amp_to_db - 20, symmetric normalize ----
    inv_w = 1.0 / melw_ref[...]                          # (1, 128): ONE divide row
    x = mel_ref[0, 0] * inv_w                            # (T, 128) channels-last
    x = jnp.abs(x)
    x = 20.0 * jnp.log10(jnp.maximum(x, MIN_LEVEL)) - REF_DB
    x = jnp.clip(NORM_A * x + NORM_B, -MAX_ABS, MAX_ABS)

    # Edge masks for zero time-padding, built once per distinct shift and
    # reused by both conv stages (pure VPU compares on one iota vreg set).
    trow = jax.lax.broadcasted_iota(jnp.int32, (T, NMEL), 0)   # NMEL == U*H2
    masks = {d: jnp.logical_and(trow + d >= 0, trow + d < T)
             for d in range(-PAD, PAD + 1) if d != 0}

    def shift_rows(v, d):
        """w[t, :] = v[t + d, :] if 0 <= t + d < T else 0.  XLU sublane
        rotation + precomputed edge mask; stays entirely in vregs."""
        if d == 0:
            return v
        rolled = pltpu.roll(v, shift=(-d) % T, axis=0)   # rolled[t] = v[(t+d) % T]
        return jnp.where(masks[d], rolled, 0.0)

    # ---- Conv1d(128 -> H, k=7, pad=3): im2col -> ONE MXU matmul ----
    lhs1 = jnp.concatenate([shift_rows(x, k - PAD) for k in range(K)],
                           axis=-1)                      # (T, K*NMEL) = (16, 896)
    h = jnp.dot(lhs1, w1_ref[...], preferred_element_type=jnp.float32)
    h = _leaky(h + b1_ref[...])                          # (T, H)

    # ---- ConvTranspose1d(H -> H2, kernel=U, stride=U): one matmul ----
    # column u*H2 + c  <=>  upsampled sample t*U + u, channel c
    y = jnp.dot(h, wup_ref[...], preferred_element_type=jnp.float32)
    y = _leaky(y + bup_ref[...])                         # (T, U*H2) = (16, 128)

    # ---- Conv1d(H2 -> 1, k=7, pad=3) + tanh, phase-interleaved layout ----
    # wav[t*U+u] = sum_{dt in {-1,0,1}} sum_{p,c} y_pad[t+dt, p*H2+c]
    #              * wout[dt*U + p - u + PAD, c]        (taps outside [0,K) = 0)
    # folded into ONE (T, 3*U*H2) x (3*U*H2, U) matmul; w2 built host-side.
    lhs2 = jnp.concatenate([shift_rows(y, dt) for dt in (-1, 0, 1)],
                           axis=-1)                      # (T, 3*U*H2) = (16, 384)
    wav = jnp.dot(lhs2, w2_ref[...], preferred_element_type=jnp.float32)
    wav = jnp.tanh(wav + bout_ref[0])                    # (T, U)
    out_ref[0] = wav


def build_stage2_weight(wout):
    """Fold Conv1d(H2->1, k=K, pad=PAD) over the stride-U upsampled sequence
    into a (3*U*H2, U) matrix acting on the phase-interleaved (T, U*H2) layout:
    row (dt+1)*U*H2 + p*H2 + c, col u  <-  wout[dt*U + p - u + PAD, c]."""
    wout = np.asarray(wout)
    m = np.zeros((3, U, H2, U), np.float32)
    for dti, dt in enumerate((-1, 0, 1)):
        for p in range(U):
            for u in range(U):
                k = dt * U + p - u + PAD
                if 0 <= k < K:
                    m[dti, p, :, u] = wout[k, :]
    return jnp.asarray(m.reshape(3 * U * H2, U))


def vocoder_forward(mel, params):
    """mel: [B, 1, T, 128] float32  ->  wav: [B, 1, S] float32."""
    melw, w1_flat, b1, wup, bup, w2, bout = params
    b, _, t, nmel = mel.shape
    assert nmel == NMEL and t % 8 == 0

    wav_tu = pl.pallas_call(
        vocoder_kernel,
        out_shape=jax.ShapeDtypeStruct((b, t, U), jnp.float32),
        grid_spec=pltpu.PrefetchScalarGridSpec(
            num_scalar_prefetch=0,
            grid=(b,),
            in_specs=[
                pl.BlockSpec((1, 1, t, NMEL), lambda i: (i, 0, 0, 0)),   # mel
                pl.BlockSpec((1, NMEL), lambda i: (0, 0)),               # mel weight
                pl.BlockSpec((K * NMEL, H), lambda i: (0, 0)),           # conv1 (im2col)
                pl.BlockSpec((1, H), lambda i: (0, 0)),                  # b1
                pl.BlockSpec((H, U * H2), lambda i: (0, 0)),             # up-conv
                pl.BlockSpec((1, U * H2), lambda i: (0, 0)),             # b_up
                pl.BlockSpec((3 * U * H2, U), lambda i: (0, 0)),         # conv_out (folded)
                pl.BlockSpec(memory_space=pltpu.MemorySpace.SMEM),       # bout scalar
            ],
            out_specs=pl.BlockSpec((1, t, U), lambda i: (i, 0, 0)),
        ),
        compiler_params=pltpu.CompilerParams(
            dimension_semantics=("parallel",)),
    )(mel, melw, w1_flat, b1, wup, bup, w2, bout)

    # (B, T, U) row-major == (B, 1, T*U): pure metadata reshape, no relayout.
    return wav_tu.reshape(b, 1, t * U)


if __name__ == "__main__":
    key = jax.random.PRNGKey(0)
    ks = jax.random.split(key, 8)

    # deterministic example input: non-normalized mel spectrogram [B, 1, T, 128]
    mel = jax.random.uniform(ks[0], (B, 1, T, NMEL), jnp.float32, 0.0, 2.0)

    # deterministic synthetic parameters
    melw = 0.5 + jax.random.uniform(ks[1], (1, NMEL), jnp.float32)           # mel weight
    w1 = jax.random.normal(ks[2], (K, NMEL, H), jnp.float32) * 0.05          # conv1 taps
    w1_flat = w1.reshape(K * NMEL, H)       # row k*NMEL + c_in == im2col lane-concat order
    b1 = jax.random.normal(ks[3], (1, H), jnp.float32) * 0.01
    wup = (jax.random.normal(ks[4], (H, U, H2), jnp.float32) * 0.05).reshape(H, U * H2)
    bup = jnp.tile(jax.random.normal(ks[5], (H2,), jnp.float32) * 0.01, U)[None, :]
    wout = jax.random.normal(ks[6], (K, H2), jnp.float32) * 0.05             # conv_out taps
    bout = jnp.zeros((1,), jnp.float32)
    w2 = build_stage2_weight(wout)

    wav = vocoder_forward(mel, (melw, w1_flat, b1, wup, bup, w2, bout))
    wav = jax.block_until_ready(wav)
    assert wav.shape == (B, 1, S), wav.shape
    assert bool(jnp.all(jnp.isfinite(wav)))
    print("KERNEL_OK")
</pallas_src>

<mosaic_0001>
module attributes {stable_mosaic.version = 11 : i64} {
  func.func @vocoder_kernel(%arg0: i32, %arg1: memref<1x1x16x128xf32, #tpu.memory_space<vmem>>, %arg2: memref<1x128xf32, #tpu.memory_space<vmem>>, %arg3: memref<896x64xf32, #tpu.memory_space<vmem>>, %arg4: memref<1x64xf32, #tpu.memory_space<vmem>>, %arg5: memref<64x128xf32, #tpu.memory_space<vmem>>, %arg6: memref<1x128xf32, #tpu.memory_space<vmem>>, %arg7: memref<384x4xf32, #tpu.memory_space<vmem>>, %arg8: memref<1xf32, #tpu.memory_space<smem>>, %arg9: memref<1x16x4xf32, #tpu.memory_space<vmem>>) attributes {dimension_semantics = [#tpu.dimension_semantics<parallel>], iteration_bounds = array<i64: 2>, scalar_prefetch = 0 : i64, scratch_operands = 0 : i64, tpu.core_type = #tpu.core_type<tc>, window_params = [{transform_indices = @transform_0, window_bounds = array<i64: 1, 1, 16, 128>}, {pipeline_mode = #tpu.pipeline_mode<synchronous>, transform_indices = @transform_1, window_bounds = array<i64: 1, 128>}, {pipeline_mode = #tpu.pipeline_mode<synchronous>, transform_indices = @transform_2, window_bounds = array<i64: 896, 64>}, {pipeline_mode = #tpu.pipeline_mode<synchronous>, transform_indices = @transform_3, window_bounds = array<i64: 1, 64>}, {pipeline_mode = #tpu.pipeline_mode<synchronous>, transform_indices = @transform_4, window_bounds = array<i64: 64, 128>}, {pipeline_mode = #tpu.pipeline_mode<synchronous>, transform_indices = @transform_5, window_bounds = array<i64: 1, 128>}, {pipeline_mode = #tpu.pipeline_mode<synchronous>, transform_indices = @transform_6, window_bounds = array<i64: 384, 4>}, {transform_indices = @transform_7, window_bounds = array<i64: 1>}, {transform_indices = @transform_8, window_bounds = array<i64: 1, 16, 4>}]} {
    %c0 = arith.constant 0 : index
    %c0_0 = arith.constant 0 : index
    %0 = vector.load %arg2[%c0, %c0_0] : memref<1x128xf32, #tpu.memory_space<vmem>>, vector<1x128xf32>
    %cst = arith.constant 1.000000e+00 : f32
    %1 = vector.broadcast %cst : f32 to vector<1x128xf32>
    %2 = arith.divf %1, %0 : vector<1x128xf32>
    %c0_1 = arith.constant 0 : index
    %c0_2 = arith.constant 0 : index
    %c0_3 = arith.constant 0 : index
    %c0_4 = arith.constant 0 : index
    %3 = vector.load %arg1[%c0_1, %c0_2, %c0_3, %c0_4] : memref<1x1x16x128xf32, #tpu.memory_space<vmem>>, vector<1x1x16x128xf32>
    %4 = vector.shape_cast %3 : vector<1x1x16x128xf32> to vector<16x128xf32>
    %5 = vector.broadcast %2 : vector<1x128xf32> to vector<16x128xf32>
    %6 = arith.mulf %4, %5 : vector<16x128xf32>
    %7 = math.absf %6 : vector<16x128xf32>
    %cst_5 = arith.constant 1.7782794E-6 : f32
    %8 = vector.broadcast %cst_5 : f32 to vector<16x128xf32>
    %9 = arith.maximumf %7, %8 : vector<16x128xf32>
    %10 = math.log %9 : vector<16x128xf32>
    %cst_6 = arith.constant 0.434294492 : f32
    %11 = vector.broadcast %cst_6 : f32 to vector<16x128xf32>
    %12 = arith.mulf %10, %11 : vector<16x128xf32>
    %cst_7 = arith.constant 2.000000e+01 : f32
    %13 = vector.broadcast %cst_7 : f32 to vector<16x128xf32>
    %14 = arith.mulf %13, %12 : vector<16x128xf32>
    %cst_8 = arith.constant 2.000000e+01 : f32
    %15 = vector.broadcast %cst_8 : f32 to vector<16x128xf32>
    %16 = arith.subf %14, %15 : vector<16x128xf32>
    %cst_9 = arith.constant 0.0695652142 : f32
    %17 = vector.broadcast %cst_9 : f32 to vector<16x128xf32>
    %18 = arith.mulf %17, %16 : vector<16x128xf32>
    %cst_10 = arith.constant 4.000000e+00 : f32
    %19 = vector.broadcast %cst_10 : f32 to vector<16x128xf32>
    %20 = arith.addf %18, %19 : vector<16x128xf32>
    %cst_11 = arith.constant -4.000000e+00 : f32
    %cst_12 = arith.constant 4.000000e+00 : f32
    %21 = vector.broadcast %cst_11 : f32 to vector<16x128xf32>
    %22 = arith.maximumf %21, %20 : vector<16x128xf32>
    %23 = vector.broadcast %cst_12 : f32 to vector<16x128xf32>
    %24 = arith.minimumf %23, %22 : vector<16x128xf32>
    %25 = tpu.iota {dimensions = array<i32: 0>} : vector<16x128xi32>
    %c-3_i32 = arith.constant -3 : i32
    %26 = vector.broadcast %c-3_i32 : i32 to vector<16x128xi32>
    %27 = arith.addi %25, %26 : vector<16x128xi32>
    %c0_i32 = arith.constant 0 : i32
    %28 = vector.broadcast %c0_i32 : i32 to vector<16x128xi32>
    %29 = arith.cmpi sge, %27, %28 : vector<16x128xi32>
    %c-3_i32_13 = arith.constant -3 : i32
    %30 = vector.broadcast %c-3_i32_13 : i32 to vector<16x128xi32>
    %31 = arith.addi %25, %30 : vector<16x128xi32>
    %c16_i32 = arith.constant 16 : i32
    %32 = vector.broadcast %c16_i32 : i32 to vector<16x128xi32>
    %33 = arith.cmpi slt, %31, %32 : vector<16x128xi32>
    %34 = arith.andi %29, %33 : vector<16x128xi1>
    %c-2_i32 = arith.constant -2 : i32
    %35 = vector.broadcast %c-2_i32 : i32 to vector<16x128xi32>
    %36 = arith.addi %25, %35 : vector<16x128xi32>
    %c0_i32_14 = arith.constant 0 : i32
    %37 = vector.broadcast %c0_i32_14 : i32 to vector<16x128xi32>
    %38 = arith.cmpi sge, %36, %37 : vector<16x128xi32>
    %c-2_i32_15 = arith.constant -2 : i32
    %39 = vector.broadcast %c-2_i32_15 : i32 to vector<16x128xi32>
    %40 = arith.addi %25, %39 : vector<16x128xi32>
    %c16_i32_16 = arith.constant 16 : i32
    %41 = vector.broadcast %c16_i32_16 : i32 to vector<16x128xi32>
    %42 = arith.cmpi slt, %40, %41 : vector<16x128xi32>
    %43 = arith.andi %38, %42 : vector<16x128xi1>
    %c-1_i32 = arith.constant -1 : i32
    %44 = vector.broadcast %c-1_i32 : i32 to vector<16x128xi32>
    %45 = arith.addi %25, %44 : vector<16x128xi32>
    %c0_i32_17 = arith.constant 0 : i32
    %46 = vector.broadcast %c0_i32_17 : i32 to vector<16x128xi32>
    %47 = arith.cmpi sge, %45, %46 : vector<16x128xi32>
    %c-1_i32_18 = arith.constant -1 : i32
    %48 = vector.broadcast %c-1_i32_18 : i32 to vector<16x128xi32>
    %49 = arith.addi %25, %48 : vector<16x128xi32>
    %c16_i32_19 = arith.constant 16 : i32
    %50 = vector.broadcast %c16_i32_19 : i32 to vector<16x128xi32>
    %51 = arith.cmpi slt, %49, %50 : vector<16x128xi32>
    %52 = arith.andi %47, %51 : vector<16x128xi1>
    %c1_i32 = arith.constant 1 : i32
    %53 = vector.broadcast %c1_i32 : i32 to vector<16x128xi32>
    %54 = arith.addi %25, %53 : vector<16x128xi32>
    %c0_i32_20 = arith.constant 0 : i32
    %55 = vector.broadcast %c0_i32_20 : i32 to vector<16x128xi32>
    %56 = arith.cmpi sge, %54, %55 : vector<16x128xi32>
    %c1_i32_21 = arith.constant 1 : i32
    %57 = vector.broadcast %c1_i32_21 : i32 to vector<16x128xi32>
    %58 = arith.addi %25, %57 : vector<16x128xi32>
    %c16_i32_22 = arith.constant 16 : i32
    %59 = vector.broadcast %c16_i32_22 : i32 to vector<16x128xi32>
    %60 = arith.cmpi slt, %58, %59 : vector<16x128xi32>
    %61 = arith.andi %56, %60 : vector<16x128xi1>
    %c2_i32 = arith.constant 2 : i32
    %62 = vector.broadcast %c2_i32 : i32 to vector<16x128xi32>
    %63 = arith.addi %25, %62 : vector<16x128xi32>
    %c0_i32_23 = arith.constant 0 : i32
    %64 = vector.broadcast %c0_i32_23 : i32 to vector<16x128xi32>
    %65 = arith.cmpi sge, %63, %64 : vector<16x128xi32>
    %c2_i32_24 = arith.constant 2 : i32
    %66 = vector.broadcast %c2_i32_24 : i32 to vector<16x128xi32>
    %67 = arith.addi %25, %66 : vector<16x128xi32>
    %c16_i32_25 = arith.constant 16 : i32
    %68 = vector.broadcast %c16_i32_25 : i32 to vector<16x128xi32>
    %69 = arith.cmpi slt, %67, %68 : vector<16x128xi32>
    %70 = arith.andi %65, %69 : vector<16x128xi1>
    %c3_i32 = arith.constant 3 : i32
    %71 = vector.broadcast %c3_i32 : i32 to vector<16x128xi32>
    %72 = arith.addi %25, %71 : vector<16x128xi32>
    %c0_i32_26 = arith.constant 0 : i32
    %73 = vector.broadcast %c0_i32_26 : i32 to vector<16x128xi32>
    %74 = arith.cmpi sge, %72, %73 : vector<16x128xi32>
    %c3_i32_27 = arith.constant 3 : i32
    %75 = vector.broadcast %c3_i32_27 : i32 to vector<16x128xi32>
    %76 = arith.addi %25, %75 : vector<16x128xi32>
    %c16_i32_28 = arith.constant 16 : i32
    %77 = vector.broadcast %c16_i32_28 : i32 to vector<16x128xi32>
    %78 = arith.cmpi slt, %76, %77 : vector<16x128xi32>
    %79 = arith.andi %74, %78 : vector<16x128xi1>
    %c3_i32_29 = arith.constant 3 : i32
    %80 = tpu.dynamic_rotate %24 by %c3_i32_29 dim 0 : vector<16x128xf32>, i32 -> vector<16x128xf32>
    %cst_30 = arith.constant 0.000000e+00 : f32
    %81 = vector.broadcast %cst_30 : f32 to vector<16x128xf32>
    %82 = arith.select %34, %80, %81 : vector<16x128xi1>, vector<16x128xf32>
    %c2_i32_31 = arith.constant 2 : i32
    %83 = tpu.dynamic_rotate %24 by %c2_i32_31 dim 0 : vector<16x128xf32>, i32 -> vector<16x128xf32>
    %cst_32 = arith.constant 0.000000e+00 : f32
    %84 = vector.broadcast %cst_32 : f32 to vector<16x128xf32>
    %85 = arith.select %43, %83, %84 : vector<16x128xi1>, vector<16x128xf32>
    %c1_i32_33 = arith.constant 1 : i32
    %86 = tpu.dynamic_rotate %24 by %c1_i32_33 dim 0 : vector<16x128xf32>, i32 -> vector<16x128xf32>
    %cst_34 = arith.constant 0.000000e+00 : f32
    %87 = vector.broadcast %cst_34 : f32 to vector<16x128xf32>
    %88 = arith.select %52, %86, %87 : vector<16x128xi1>, vector<16x128xf32>
    %c15_i32 = arith.constant 15 : i32
    %89 = tpu.dynamic_rotate %24 by %c15_i32 dim 0 : vector<16x128xf32>, i32 -> vector<16x128xf32>
    %cst_35 = arith.constant 0.000000e+00 : f32
    %90 = vector.broadcast %cst_35 : f32 to vector<16x128xf32>
    %91 = arith.select %61, %89, %90 : vector<16x128xi1>, vector<16x128xf32>
    %c14_i32 = arith.constant 14 : i32
    %92 = tpu.dynamic_rotate %24 by %c14_i32 dim 0 : vector<16x128xf32>, i32 -> vector<16x128xf32>
    %cst_36 = arith.constant 0.000000e+00 : f32
    %93 = vector.broadcast %cst_36 : f32 to vector<16x128xf32>
    %94 = arith.select %70, %92, %93 : vector<16x128xi1>, vector<16x128xf32>
    %c13_i32 = arith.constant 13 : i32
    %95 = tpu.dynamic_rotate %24 by %c13_i32 dim 0 : vector<16x128xf32>, i32 -> vector<16x128xf32>
    %cst_37 = arith.constant 0.000000e+00 : f32
    %96 = vector.broadcast %cst_37 : f32 to vector<16x128xf32>
    %97 = arith.select %79, %95, %96 : vector<16x128xi1>, vector<16x128xf32>
    %98 = tpu.concatenate %82, %85, %88, %24, %91, %94, %97 in 1 : vector<16x128xf32>, vector<16x128xf32>, vector<16x128xf32>, vector<16x128xf32>, vector<16x128xf32>, vector<16x128xf32>, vector<16x128xf32> -> vector<16x896xf32>
    %c0_38 = arith.constant 0 : index
    %c0_39 = arith.constant 0 : index
    %99 = vector.load %arg3[%c0_38, %c0_39] : memref<896x64xf32, #tpu.memory_space<vmem>>, vector<896x64xf32>
    %cst_40 = arith.constant dense<0.000000e+00> : vector<16x64xf32>
    %100 = tpu.matmul %98, %99, %cst_40 {dimension_numbers = #tpu.dot_dimension_numbers<[1], [0], [0], [1], [0, 0, 1, 1], [], []>} : vector<16x896xf32>, vector<896x64xf32>, vector<16x64xf32> -> vector<16x64xf32>
    %c0_41 = arith.constant 0 : index
    %c0_42 = arith.constant 0 : index
    %101 = vector.load %arg4[%c0_41, %c0_42] : memref<1x64xf32, #tpu.memory_space<vmem>>, vector<1x64xf32>
    %102 = vector.broadcast %101 : vector<1x64xf32> to vector<16x64xf32>
    %103 = arith.addf %100, %102 : vector<16x64xf32>
    %cst_43 = arith.constant 2.000000e-01 : f32
    %104 = vector.broadcast %cst_43 : f32 to vector<16x64xf32>
    %105 = arith.mulf %104, %103 : vector<16x64xf32>
    %106 = arith.maximumf %103, %105 : vector<16x64xf32>
    %c0_44 = arith.constant 0 : index
    %c0_45 = arith.constant 0 : index
    %107 = vector.load %arg5[%c0_44, %c0_45] : memref<64x128xf32, #tpu.memory_space<vmem>>, vector<64x128xf32>
    %cst_46 = arith.constant dense<0.000000e+00> : vector<16x128xf32>
    %108 = tpu.matmul %106, %107, %cst_46 {dimension_numbers = #tpu.dot_dimension_numbers<[1], [0], [0], [1], [0, 0, 1, 1], [], []>} : vector<16x64xf32>, vector<64x128xf32>, vector<16x128xf32> -> vector<16x128xf32>
    %c0_47 = arith.constant 0 : index
    %c0_48 = arith.constant 0 : index
    %109 = vector.load %arg6[%c0_47, %c0_48] : memref<1x128xf32, #tpu.memory_space<vmem>>, vector<1x128xf32>
    %110 = vector.broadcast %109 : vector<1x128xf32> to vector<16x128xf32>
    %111 = arith.addf %108, %110 : vector<16x128xf32>
    %cst_49 = arith.constant 2.000000e-01 : f32
    %112 = vector.broadcast %cst_49 : f32 to vector<16x128xf32>
    %113 = arith.mulf %112, %111 : vector<16x128xf32>
    %114 = arith.maximumf %111, %113 : vector<16x128xf32>
    %c1_i32_50 = arith.constant 1 : i32
    %115 = tpu.dynamic_rotate %114 by %c1_i32_50 dim 0 : vector<16x128xf32>, i32 -> vector<16x128xf32>
    %cst_51 = arith.constant 0.000000e+00 : f32
    %116 = vector.broadcast %cst_51 : f32 to vector<16x128xf32>
    %117 = arith.select %52, %115, %116 : vector<16x128xi1>, vector<16x128xf32>
    %c15_i32_52 = arith.constant 15 : i32
    %118 = tpu.dynamic_rotate %114 by %c15_i32_52 dim 0 : vector<16x128xf32>, i32 -> vector<16x128xf32>
    %cst_53 = arith.constant 0.000000e+00 : f32
    %119 = vector.broadcast %cst_53 : f32 to vector<16x128xf32>
    %120 = arith.select %61, %118, %119 : vector<16x128xi1>, vector<16x128xf32>
    %121 = tpu.concatenate %117, %114, %120 in 1 : vector<16x128xf32>, vector<16x128xf32>, vector<16x128xf32> -> vector<16x384xf32>
    %c0_54 = arith.constant 0 : index
    %c0_55 = arith.constant 0 : index
    %122 = vector.load %arg7[%c0_54, %c0_55] : memref<384x4xf32, #tpu.memory_space<vmem>>, vector<384x4xf32>
    %cst_56 = arith.constant dense<0.000000e+00> : vector<16x4xf32>
    %123 = tpu.matmul %121, %122, %cst_56 {dimension_numbers = #tpu.dot_dimension_numbers<[1], [0], [0], [1], [0, 0, 1, 1], [], []>} : vector<16x384xf32>, vector<384x4xf32>, vector<16x4xf32> -> vector<16x4xf32>
    %c0_57 = arith.constant 0 : index
    %124 = memref.load %arg8[%c0_57] : memref<1xf32, #tpu.memory_space<smem>>
    %125 = vector.broadcast %124 : f32 to vector<16x4xf32>
    %126 = arith.addf %123, %125 : vector<16x4xf32>
    %127 = math.tanh %126 : vector<16x4xf32>
    %c0_58 = arith.constant 0 : index
    %c0_59 = arith.constant 0 : index
    %c0_60 = arith.constant 0 : index
    %128 = vector.load %arg9[%c0_58, %c0_59, %c0_60] : memref<1x16x4xf32, #tpu.memory_space<vmem>>, vector<1x16x4xf32>
    %129 = vector.shape_cast %128 : vector<1x16x4xf32> to vector<16x4xf32>
    %130 = vector.shape_cast %127 : vector<16x4xf32> to vector<1x16x4xf32>
    tpu.vector_store %arg9[%c0_58, %c0_59, %c0_60], %130 {strides = array<i32>} : memref<1x16x4xf32, #tpu.memory_space<vmem>>, vector<1x16x4xf32>,
    return
  }
  func.func @transform_0(%arg0: i32) -> (i32, i32, i32, i32) {
    %c0_i32 = arith.constant 0 : i32
    %c0_i32_0 = arith.constant 0 : i32
    %c0_i32_1 = arith.constant 0 : i32
    %c0_i32_2 = arith.constant 0 : i32
    return %arg0, %c0_i32, %c0_i32_0, %c0_i32_1 : i32, i32, i32, i32
  }
  func.func @transform_1(%arg0: i32) -> (i32, i32) {
    %c0_i32 = arith.constant 0 : i32
    %c0_i32_0 = arith.constant 0 : i32
    %c0_i32_1 = arith.constant 0 : i32
    return %c0_i32, %c0_i32_0 : i32, i32
  }
  func.func @transform_2(%arg0: i32) -> (i32, i32) {
    %c0_i32 = arith.constant 0 : i32
    %c0_i32_0 = arith.constant 0 : i32
    %c0_i32_1 = arith.constant 0 : i32
    return %c0_i32, %c0_i32_0 : i32, i32
  }
  func.func @transform_3(%arg0: i32) -> (i32, i32) {
    %c0_i32 = arith.constant 0 : i32
    %c0_i32_0 = arith.constant 0 : i32
    %c0_i32_1 = arith.constant 0 : i32
    return %c0_i32, %c0_i32_0 : i32, i32
  }
  func.func @transform_4(%arg0: i32) -> (i32, i32) {
    %c0_i32 = arith.constant 0 : i32
    %c0_i32_0 = arith.constant 0 : i32
    %c0_i32_1 = arith.constant 0 : i32
    return %c0_i32, %c0_i32_0 : i32, i32
  }
  func.func @transform_5(%arg0: i32) -> (i32, i32) {
    %c0_i32 = arith.constant 0 : i32
    %c0_i32_0 = arith.constant 0 : i32
    %c0_i32_1 = arith.constant 0 : i32
    return %c0_i32, %c0_i32_0 : i32, i32
  }
  func.func @transform_6(%arg0: i32) -> (i32, i32) {
    %c0_i32 = arith.constant 0 : i32
    %c0_i32_0 = arith.constant 0 : i32
    %c0_i32_1 = arith.constant 0 : i32
    return %c0_i32, %c0_i32_0 : i32, i32
  }
  func.func @transform_7(%arg0: i32) -> i32 {
    %c0_i32 = arith.constant 0 : i32
    %c0_i32_0 = arith.constant 0 : i32
    return %c0_i32 : i32
  }
  func.func @transform_8(%arg0: i32) -> (i32, i32, i32) {
    %c0_i32 = arith.constant 0 : i32
    %c0_i32_0 = arith.constant 0 : i32
    %c0_i32_1 = arith.constant 0 : i32
    return %arg0, %c0_i32, %c0_i32_0 : i32, i32, i32
  }
}

</mosaic_0001>

<bundles_post_ra>
// kernel: tpu_custom_call.1
= control target key start
LH: loop header
LB: loop body
LE: loop exit
PB: predicated region body
PF: predicated region fallthrough
CT: control target
= control target key end

     0   :  { %s1621_s29 = smov 0   ;;  %s2274_s0 = inlined_call_operand.vmem [shape: f32[2,1,16,128], index: 0, kind: input, shape index: {}]   ;;  %s2275_s1 = inlined_call_operand.vmem [shape: f32[1,128], index: 1, kind: input, shape index: {}]   ;;  %s2276_s2 = inlined_call_operand.vmem [shape: f32[896,64], index: 2, kind: input, shape index: {}]   ;;  %s2277_s3 = inlined_call_operand.vmem [shape: f32[1,64], index: 3, kind: input, shape index: {}]   ;;  %s2278_s4 = inlined_call_operand.vmem [shape: f32[64,128], index: 4, kind: input, shape index: {}]   ;;  %s2279_s5 = inlined_call_operand.vmem [shape: f32[1,128], index: 5, kind: input, shape index: {}]   ;;  %s2280_s6 = inlined_call_operand.vmem [shape: f32[384,4], index: 6, kind: input, shape index: {}]   ;;  %s2281_s7 = inlined_call_operand.<no memory space> [shape: f32[1], index: 7, kind: input, shape index: {}]   ;;  %s2282_s8 = inlined_call_operand.vmem [shape: f32[2,16,4], index: 8, kind: output, shape index: {}]  }
   0x1   :  { %13 = sst [smem:[#allocation2]] %s2281_s7 }
   0x2 LB: > { %s1231_s30 = sadd.s32 4294967295, %s1571_s29   ;;  %p1235_p0 = scmp.ge.s32.totalorder %s1571_s29, 1  ;;  %s1571_s29 = sphi %s1621_s29, %s19_s29  }
   0x3   : > { %p263_p1 = scmp.lt.s32.totalorder %s1571_s29, 3 }
   0x5   : > { %p264_p2 = pnand %p1235_p0, %p263_p1 }
   0x6   : > { %p1766_p3 = scmp.lt.s32.totalorder (!%p264_p2), %s1231_s30, 1  ;;  %s1019_s10 = sld [smem:[#allocation2]] (!%p264_p2) }
   0x7   : > { %267 = sbr.rel (%p264_p2) target bundleno = 747 (0x2eb), region = 52 }
   0xc   : > { %v466_v0 = vld [vmem:[%s2276_s2 + $0xf8] sm:$0xff]  ;;  %v465_v2 = vld [vmem:[%s2276_s2 + $0xf0] sm:$0xff]  ;;  %v464_v5 = vld [vmem:[%s2276_s2 + $0xe8] sm:$0xff]  ;;  %v313_v52 = vlaneseq  ;;  %s2285_s30 = smov (!%p1766_p3, %s1231_s30), 1  ;;  %vm873_vm12 = vcmask 523264   ;;  %vm1173_vm13 = vcmask 31744  }
   0xd   : > { %v450_v1 = vld [vmem:[%s2276_s2 + $0x78] sm:$0xff]  ;;  %1260 = vmatprep.subr.mxu0 %v466_v0  ;;  %v449_v3 = vld [vmem:[%s2276_s2 + $0x70] sm:$0xff]  ;;  %v448_v8 = vld [vmem:[%s2276_s2 + $0x68] sm:$0xff]  ;;  %s1258_s26 = sshll.u32 %s2285_s30, 4 }
   0xe   : > { %v498_v4 = vld [vmem:[%s2276_s2 + $0x1f8] sm:$0xff]  ;;  %1261 = vmatpush3.msra.mxu0 %v450_v1  ;;  %v497_v7 = vld [vmem:[%s2276_s2 + $0x1f0] sm:$0xff]  ;;  %v463_v10 = vld [vmem:[%s2276_s2 + $0xe0] sm:$0xff]  ;;  %v1821_v61 = vshrl.u32 %v313_v52, 7  ;;  %s301_s14 = scalar_lea.vmem %s2274_s0, %s1258_s26  ;;  %s306_s12 = scalar_lea.vmem %s2282_s8, %s1258_s26 }
   0xf   : > { %1298 = vmatprep.subr.mxu1 %v498_v4  ;;  %v482_v6 = vld [vmem:[%s2276_s2 + $0x178] sm:$0xff]  ;;  %1262 = vmatprep.subr.mxu0 %v465_v2  ;;  %v481_v9 = vld [vmem:[%s2276_s2 + $0x170] sm:$0xff]  ;;  %v496_v11 = vld [vmem:[%s2276_s2 + $0x1e8] sm:$0xff] }
  0x10   : > { %1299 = vmatpush3.msra.mxu1 %v482_v6  ;;  %1263 = vmatpush3.msra.mxu0 %v449_v3  ;;  %v480_v12 = vld [vmem:[%s2276_s2 + $0x168] sm:$0xff]  ;;  %v447_v13 = vld [vmem:[%s2276_s2 + $0x60] sm:$0xff]  ;;  %v462_v15 = vld [vmem:[%s2276_s2 + $0xd8] sm:$0xff]  ;;  %v315_v4 = vsub.s32 0, %v1821_v61  ;;  %vm402_vm1 = vcmp.lt.s32.totalorder %v1821_v61, 2  ;;  %vm395_vm2 = vcmp.lt.s32.totalorder %v1821_v61, 3 }
  0x11   : > { %1300 = vmatprep.subr.mxu1 %v497_v7  ;;  %1264 = vmatprep.subr.mxu0 %v464_v5  ;;  %v495_v14 = vld [vmem:[%s2276_s2 + $0x1e0] sm:$0xff]  ;;  %v446_v17 = vld [vmem:[%s2276_s2 + $0x58] sm:$0xff]  ;;  %v461_v19 = vld [vmem:[%s2276_s2 + $0xd0] sm:$0xff]  ;;  %vm409_vm3 = vcmp.lt.s32.totalorder %v1821_v61, 1  ;;  %vm423_vm6 = vcmp.lt.s32.totalorder %v1821_v61, 6  ;;  %vm416_vm7 = vcmp.lt.s32.totalorder %v1821_v61, 7 }
  0x12   : > { %1301 = vmatpush3.msra.mxu1 %v481_v9  ;;  %1265 = vmatpush3.msra.mxu0 %v448_v8  ;;  %v479_v16 = vld [vmem:[%s2276_s2 + $0x160] sm:$0xff]  ;;  %v494_v18 = vld [vmem:[%s2276_s2 + $0x1d8] sm:$0xff]  ;;  %v445_v21 = vld [vmem:[%s2276_s2 + $0x50] sm:$0xff]  ;;  %vm430_vm8 = vcmp.lt.s32.totalorder %v1821_v61, 5 }
  0x13   : > { %1302 = vmatprep.subr.mxu1 %v496_v11  ;;  %1266 = vmatprep.subr.mxu0 %v463_v10  ;;  %v478_v20 = vld [vmem:[%s2276_s2 + $0x158] sm:$0xff]  ;;  %v493_v22 = vld [vmem:[%s2276_s2 + $0x1d0] sm:$0xff]  ;;  %v460_v23 = vld [vmem:[%s2276_s2 + $0xc8] sm:$0xff] }
  0x14   : > { %1303 = vmatpush3.msra.mxu1 %v480_v12  ;;  %1267 = vmatpush3.msra.mxu0 %v447_v13  ;;  %v477_v24 = vld [vmem:[%s2276_s2 + $0x150] sm:$0xff]  ;;  %v444_v25 = vld [vmem:[%s2276_s2 + $0x48] sm:$0xff]  ;;  %v459_v27 = vld [vmem:[%s2276_s2 + $0xc0] sm:$0xff] }
  0x15   : > { %1304 = vmatprep.subr.mxu1 %v495_v14  ;;  %1268 = vmatprep.subr.mxu0 %v462_v15  ;;  %v492_v26 = vld [vmem:[%s2276_s2 + $0x1c8] sm:$0xff]  ;;  %v443_v29 = vld [vmem:[%s2276_s2 + $0x40] sm:$0xff]  ;;  %v458_v31 = vld [vmem:[%s2276_s2 + $0xb8] sm:$0xff] }
  0x16   : > { %1305 = vmatpush3.msra.mxu1 %v479_v16  ;;  %1269 = vmatpush3.msra.mxu0 %v446_v17  ;;  %v476_v28 = vld [vmem:[%s2276_s2 + $0x148] sm:$0xff]  ;;  %v491_v30 = vld [vmem:[%s2276_s2 + $0x1c0] sm:$0xff]  ;;  %v442_v33 = vld [vmem:[%s2276_s2 + $0x38] sm:$0xff] }
  0x17   : > { %1306 = vmatprep.subr.mxu1 %v494_v18  ;;  %1270 = vmatprep.subr.mxu0 %v461_v19  ;;  %v475_v32 = vld [vmem:[%s2276_s2 + $0x140] sm:$0xff]  ;;  %v490_v34 = vld [vmem:[%s2276_s2 + $0x1b8] sm:$0xff]  ;;  %v457_v35 = vld [vmem:[%s2276_s2 + $0xb0] sm:$0xff] }
  0x18   : > { %1307 = vmatpush3.msra.mxu1 %v478_v20  ;;  %1271 = vmatpush3.msra.mxu0 %v445_v21  ;;  %v474_v36 = vld [vmem:[%s2276_s2 + $0x138] sm:$0xff]  ;;  %v441_v37 = vld [vmem:[%s2276_s2 + $0x30] sm:$0xff]  ;;  %v456_v39 = vld [vmem:[%s2276_s2 + $0xa8] sm:$0xff] }
  0x19   : > { %1308 = vmatprep.subr.mxu1 %v493_v22  ;;  %1272 = vmatprep.subr.mxu0 %v460_v23  ;;  %v489_v38 = vld [vmem:[%s2276_s2 + $0x1b0] sm:$0xff]  ;;  %v440_v41 = vld [vmem:[%s2276_s2 + $0x28] sm:$0xff]  ;;  %v455_v43 = vld [vmem:[%s2276_s2 + $0xa0] sm:$0xff] }
  0x1a   : > { %1309 = vmatpush3.msra.mxu1 %v477_v24  ;;  %1273 = vmatpush3.msra.mxu0 %v444_v25  ;;  %v473_v40 = vld [vmem:[%s2276_s2 + $0x130] sm:$0xff]  ;;  %v488_v42 = vld [vmem:[%s2276_s2 + $0x1a8] sm:$0xff]  ;;  %v307_v45 = vld [vmem:[%s2275_s1] sm:$0x1] }
  0x1b   : > { %1310 = vmatprep.subr.mxu1 %v492_v26  ;;  %1274 = vmatprep.subr.mxu0 %v459_v27  ;;  %v472_v44 = vld [vmem:[%s2276_s2 + $0x128] sm:$0xff]  ;;  %v439_v46 = vld [vmem:[%s2276_s2 + $0x20] sm:$0xff]  ;;  %1555 = vrcp.f32 %v307_v45  ;;  %v454_v48 = vld [vmem:[%s2276_s2 + $0x98] sm:$0xff] }
  0x1c   : > { %1311 = vmatpush3.msra.mxu1 %v476_v28  ;;  %1275 = vmatpush3.msra.mxu0 %v443_v29  ;;  %v487_v47 = vld [vmem:[%s2276_s2 + $0x1a0] sm:$0xff]  ;;  %v438_v50 = vld [vmem:[%s2276_s2 + $0x18] sm:$0xff]  ;;  %v453_v53 = vld [vmem:[%s2276_s2 + $0x90] sm:$0xff]  ;;  %v353_v28 = vadd.s32 4294967294, %v1821_v61 }
  0x1d   : > { %1312 = vmatprep.subr.mxu1 %v491_v30  ;;  %1276 = vmatprep.subr.mxu0 %v458_v31  ;;  %v471_v49 = vld [vmem:[%s2276_s2 + $0x120] sm:$0xff]  ;;  %v486_v51 = vld [vmem:[%s2276_s2 + $0x198] sm:$0xff]  ;;  %v437_v55 = vld [vmem:[%s2276_s2 + $0x10] sm:$0xff]  ;;  %v1853_v31 = vadd.s32 4294967295, %v1821_v61 }
  0x1e   : > { %1313 = vmatpush3.msra.mxu1 %v475_v32  ;;  %1277 = vmatpush3.msra.mxu0 %v442_v33  ;;  %v470_v54 = vld [vmem:[%s2276_s2 + $0x118] sm:$0xff]  ;;  %v485_v56 = vld [vmem:[%s2276_s2 + $0x190] sm:$0xff]  ;;  %v452_v57 = vld [vmem:[%s2276_s2 + $0x88] sm:$0xff]  ;;  %v345_v33 = vadd.s32 4294967293, %v1821_v61  ;;  %vm355_vm0 = vcmp.ge.s32.totalorder %v353_v28, 0 }
  0x1f   : > { %1314 = vmatprep.subr.mxu1 %v490_v34  ;;  %1278 = vmatprep.subr.mxu0 %v457_v35  ;;  %v469_v58 = vld [vmem:[%s2276_s2 + $0x110] sm:$0xff]  ;;  %v436_v59 = vld [vmem:[%s2276_s2 + $0x8] sm:$0xff]  ;;  %v451_v62 = vld [vmem:[%s2276_s2 + $0x80] sm:$0xff]  ;;  %vm363_vm4 = vcmp.ge.s32.totalorder %v1853_v31, 0 }
  0x20   : > { %1315 = vmatpush3.msra.mxu1 %v474_v36  ;;  %1279 = vmatpush3.msra.mxu0 %v441_v37  ;;  %v484_v60 = vld [vmem:[%s2276_s2 + $0x188] sm:$0xff]  ;;  %v435_v0 = vld [vmem:[%s2276_s2] sm:$0xff]  ;;  %v530_v2 = vld [vmem:[%s2276_s2 + $0x2f8] sm:$0xff]  ;;  %vm347_vm5 = vcmp.ge.s32.totalorder %v345_v33, 0 }
  0x21   : > { %1316 = vmatprep.subr.mxu1 %v489_v38  ;;  %1280 = vmatprep.subr.mxu0 %v456_v39  ;;  %v468_v63 = vld [vmem:[%s2276_s2 + $0x108] sm:$0xff]  ;;  %v483_v1 = vld [vmem:[%s2276_s2 + $0x180] sm:$0xff]  ;;  %v546_v5 = vld [vmem:[%s2276_s2 + $0x378] sm:$0xff] }
  0x22   : > { %1317 = vmatpush3.msra.mxu1 %v473_v40  ;;  %1281 = vmatpush3.msra.mxu0 %v440_v41  ;;  %v467_v3 = vld [vmem:[%s2276_s2 + $0x100] sm:$0xff]  ;;  %v311_v8 = vld [vmem:[%s301_s14 + $0x8] sm:$0xff]  ;;  %v545_v45 = vld [vmem:[%s2276_s2 + $0x370] sm:$0xff] }
  0x23   : > { %1318 = vmatprep.subr.mxu1 %v488_v42  ;;  %1282 = vmatprep.subr.mxu0 %v455_v43  ;;  %v310_v7 = vld [vmem:[%s301_s14] sm:$0xff]  ;;  %v514_v43 = vld [vmem:[%s2276_s2 + $0x278] sm:$0xff] }
  0x24   : > { %1319 = vmatpush3.msra.mxu1 %v472_v44  ;;  %1283 = vmatpush3.msra.mxu0 %v439_v46  ;;  %v529_v46 = vld [vmem:[%s2276_s2 + $0x2f0] sm:$0xff]  ;;  %v527_v52 = vld [vmem:[%s2276_s2 + $0x2e0] sm:$0xff] }
  0x25   : > { %1320 = vmatprep.subr.mxu1 %v487_v47  ;;  %1284 = vmatprep.subr.mxu0 %v454_v48  ;;  %v513_v47 = vld [vmem:[%s2276_s2 + $0x270] sm:$0xff]  ;;  %v544_v48 = vld [vmem:[%s2276_s2 + $0x368] sm:$0xff] }
  0x26   : > { %1321 = vmatpush3.msra.mxu1 %v471_v49  ;;  %1285 = vmatpush3.msra.mxu0 %v438_v50  ;;  %v528_v49 = vld [vmem:[%s2276_s2 + $0x2e8] sm:$0xff] }
  0x27   : > { %1322 = vmatprep.subr.mxu1 %v486_v51  ;;  %1286 = vmatprep.subr.mxu0 %v453_v53  ;;  %v512_v50 = vld [vmem:[%s2276_s2 + $0x268] sm:$0xff]  ;;  %v543_v51 = vld [vmem:[%s2276_s2 + $0x360] sm:$0xff] }
  0x28   : > { %1323 = vmatpush3.msra.mxu1 %v470_v54  ;;  %1287 = vmatpush3.msra.mxu0 %v437_v55  ;;  %v1556_v6 = vpop.eup %1555  ;;  %v511_v53 = vld [vmem:[%s2276_s2 + $0x260] sm:$0xff]  ;;  %v542_v54 = vld [vmem:[%s2276_s2 + $0x358] sm:$0xff] }
  0x29   : > { %1324 = vmatprep.subr.mxu1 %v485_v56  ;;  %1288 = vmatprep.subr.mxu0 %v452_v57  ;;  %v316_v9 = vrot.slane %v1556_v6, %v315_v4  ;;  %v526_v55 = vld [vmem:[%s2276_s2 + $0x2d8] sm:$0xff]  ;;  %v541_v57 = vld [vmem:[%s2276_s2 + $0x350] sm:$0xff] }
  0x2a   : > { %1325 = vmatpush3.msra.mxu1 %v469_v58  ;;  %1289 = vmatpush3.msra.mxu0 %v436_v59  ;;  %v510_v56 = vld [vmem:[%s2276_s2 + $0x258] sm:$0xff]  ;;  %v525_v58 = vld [vmem:[%s2276_s2 + $0x2d0] sm:$0xff] }
  0x2b   : > { %1326 = vmatprep.subr.mxu1 %v484_v60  ;;  %1290 = vmatprep.subr.mxu0 %v451_v62  ;;  %v318_v10 = vmul.f32 %v316_v9, %v310_v7  ;;  %v319_v11 = vmul.f32 %v316_v9, %v311_v8  ;;  %v509_v59 = vld [vmem:[%s2276_s2 + $0x250] sm:$0xff]  ;;  %v540_v60 = vld [vmem:[%s2276_s2 + $0x348] sm:$0xff]  ;;  %v522_v4 = vld [vmem:[%s2276_s2 + $0x2b8] sm:$0xff] }
  0x2c   : > { %1327 = vmatpush3.msra.mxu1 %v468_v63  ;;  %1291 = vmatpush3.msra.mxu0 %v435_v0  ;;  %v524_v62 = vld [vmem:[%s2276_s2 + $0x2c8] sm:$0xff]  ;;  %v539_v0 = vld [vmem:[%s2276_s2 + $0x340] sm:$0xff]  ;;  %v537_v6 = vld [vmem:[%s2276_s2 + $0x330] sm:$0xff] }
  0x2d   : > { %1328 = vmatprep.subr.mxu1 %v483_v1  ;;  %1336 = vmatprep.subr.mxu0 %v530_v2  ;;  %v320_v12 = vand.u32 2147483647, %v318_v10  ;;  %v321_v13 = vand.u32 2147483647, %v319_v11  ;;  %v508_v63 = vld [vmem:[%s2276_s2 + $0x248] sm:$0xff]  ;;  %v523_v1 = vld [vmem:[%s2276_s2 + $0x2c0] sm:$0xff] }
  0x2e   : > { %1329 = vmatpush3.msra.mxu1 %v467_v3  ;;  %v507_v2 = vld [vmem:[%s2276_s2 + $0x240] sm:$0xff]  ;;  %v538_v3 = vld [vmem:[%s2276_s2 + $0x338] sm:$0xff]  ;;  %v521_v7 = vld [vmem:[%s2276_s2 + $0x2b0] sm:$0xff] }
  0x2f   : > { %1458 = vmatprep.subr.mxu1 %v546_v5  ;;  %v322_v14 = vmax.f32 %v320_v12, 1.7782794e-06  ;;  %v323_v15 = vmax.f32 %v321_v13, 1.7782794e-06  ;;  %v505_v8 = vld [vmem:[%s2276_s2 + $0x230] sm:$0xff]  ;;  %v536_v9 = vld [vmem:[%s2276_s2 + $0x328] sm:$0xff] }
  0x30   : > { %v520_v10 = vld [vmem:[%s2276_s2 + $0x2a8] sm:$0xff]  ;;  %v519_v13 = vld [vmem:[%s2276_s2 + $0x2a0] sm:$0xff] }
  0x31   : > { %1557 = vlog2.f32 %v322_v14  ;;  %v504_v12 = vld [vmem:[%s2276_s2 + $0x228] sm:$0xff] }
  0x32   : > { %1559 = vlog2.f32 %v323_v15  ;;  %v503_v15 = vld [vmem:[%s2276_s2 + $0x220] sm:$0xff] }
  0x3e   : > { %v1558_v16 = vpop.eup %1557 }
  0x3f   : > { %v1560_v17 = vpop.eup %1559  ;;  %v325_v18 = vmul.f32 0.6931472, %v1558_v16  ;;  %v535_v16 = vld [vmem:[%s2276_s2 + $0x320] sm:$0xff] }
  0x40   : > { %v327_v19 = vmul.f32 0.6931472, %v1560_v17  ;;  %v518_v17 = vld [vmem:[%s2276_s2 + $0x298] sm:$0xff] }
  0x41   : > { %v328_v20 = vmul.f32 0.4342945, %v325_v18  ;;  %v502_v18 = vld [vmem:[%s2276_s2 + $0x218] sm:$0xff] }
  0x42   : > { %v329_v21 = vmul.f32 0.4342945, %v327_v19  ;;  %v344_v19 = vadd.s32 8, %v1821_v61 }
  0x43   : > { %v330_v22 = vmul.f32 20.0, %v328_v20  ;;  %v517_v20 = vld [vmem:[%s2276_s2 + $0x290] sm:$0xff] }
  0x44   : > { %v331_v23 = vmul.f32 20.0, %v329_v21  ;;  %v378_v33 = vadd.s32 2, %v344_v19 }
  0x45   : > { %v1240_v24 = vadd.f32 -20.0, %v330_v22 }
  0x46   : > { %v1241_v25 = vadd.f32 -20.0, %v331_v23  ;;  %vm382_vm9 = vcmp.lt.s32.totalorder %v378_v33, 16 }
  0x47   : > { %v334_v26 = vmul.f32 0.069565214, %v1240_v24  ;;  %v501_v24 = vld [vmem:[%s2276_s2 + $0x210] sm:$0xff] }
  0x48   : > { %v335_v27 = vmul.f32 0.069565214, %v1241_v25  ;;  %v534_v25 = vld [vmem:[%s2276_s2 + $0x318] sm:$0xff] }
  0x49   : > { %v336_v29 = vadd.f32 4.0, %v334_v26  ;;  %v516_v26 = vld [vmem:[%s2276_s2 + $0x288] sm:$0xff] }
  0x4a   : > { %v337_v30 = vadd.f32 4.0, %v335_v27 }
  0x4b   : > { %v1855_v32 = vclamps-f32 %v336_v29, 4.0  ;;  %v500_v29 = vld [vmem:[%s2276_s2 + $0x208] sm:$0xff] }
  0x4c   : > { %v1858_v34 = vclamps-f32 %v337_v30, 4.0  ;;  %v533_v30 = vld [vmem:[%s2276_s2 + $0x310] sm:$0xff] }
  0x4d   : > { %v400_v35 = vrot.slane %v1855_v32, 6  ;;  %v393_v36 = vrot.slane %v1855_v32, 5  ;;  %693 = vmatprep.mubr.f32.mxu1 %v1855_v32  ;;  %v407_v37 = vrot.slane %v1855_v32, 7  ;;  %v421_v22 = vrot.slane %v1855_v32, 2 }
  0x4e   : > { %v401_v38 = vrot.slane %v1858_v34, 6  ;;  %v394_v39 = vrot.slane %v1858_v34, 5  ;;  %v408_v40 = vrot.slane %v1858_v34, 7  ;;  %v422_v23 = vrot.slane %v1858_v34, 2 }
  0x4f   : > { %v414_v27 = vrot.slane %v1855_v32, 1  ;;  %v415_v28 = vrot.slane %v1858_v34, 1 }
  0x50   : > { %v404_v41 = vsel %vm402_vm1, %v401_v38, %v400_v35  ;;  %v397_v42 = vsel %vm395_vm2, %v394_v39, %v393_v36  ;;  %v411_v44 = vsel %vm409_vm3, %v408_v40, %v407_v37  ;;  %v403_v11 = vsel %vm402_vm1, %v400_v35, %v401_v38  ;;  %v515_v35 = vld [vmem:[%s2276_s2 + $0x280] sm:$0xff] }
  0x51   : > { %1245 = vmatprep.mubr.msk.f32.mxu0 %vm355_vm0, %v404_v41  ;;  %1247 = vmatmul.mubr.msk.f32.vlgmr.msra.gmra.mxu1 %vm363_vm4, %v411_v44  ;;  %v396_v14 = vsel %vm395_vm2, %v393_v36, %v394_v39  ;;  %v410_v21 = vsel %vm409_vm3, %v407_v37, %v408_v40  ;;  %v424_v36 = vsel %vm423_vm6, %v421_v22, %v422_v23  ;;  %v428_v37 = vrot.slane %v1855_v32, 3  ;;  %v499_v39 = vld [vmem:[%s2276_s2 + $0x200] sm:$0xff]  ;;  %v532_v41 = vld [vmem:[%s2276_s2 + $0x308] sm:$0xff] }
  0x52   : > { %1246 = vmatmul.mubr.msk.f32.vlgmr.msra.gmra.mxu0 %vm347_vm5, %v397_v42  ;;  %1459 = vmatpush3.msra.mxu1 %v546_v5  ;;  %v506_v5 = vld [vmem:[%s2276_s2 + $0x238] sm:$0xff]  ;;  %v429_v38 = vrot.slane %v1858_v34, 3  ;;  %v417_v40 = vsel %vm416_vm7, %v414_v27, %v415_v28  ;;  %v2060_v32 = vadd.s32 1, %v344_v19  ;;  %v425_v42 = vsel %vm423_vm6, %v422_v23, %v421_v22 }
  0x53   : > { %1337 = vmatpush3.msra.mxu0 %v514_v43  ;;  %1460 = vmatprep.subr.mxu1 %v545_v45  ;;  %v531_v43 = vld [vmem:[%s2276_s2 + $0x300] sm:$0xff] }
  0x54   : > { %1338 = vmatprep.subr.mxu0 %v529_v46  ;;  %1461 = vmatpush3.msra.mxu1 %v545_v45  ;;  %v431_v44 = vsel %vm430_vm8, %v428_v37, %v429_v38  ;;  %v432_v45 = vsel %vm430_vm8, %v429_v38, %v428_v37  ;;  %vm374_vm10 = vcmp.lt.s32.totalorder %v2060_v32, 16  ;;  %v418_v46 = vsel %vm416_vm7, %v415_v28, %v414_v27 }
  0x55   : > { %1339 = vmatpush3.msra.mxu0 %v513_v47  ;;  %1462 = vmatprep.subr.mxu1 %v544_v48  ;;  %v865_v47 = vld [vmem:[%s2278_s4 + $0x38] sm:$0xff] }
  0x56   : > { %1340 = vmatprep.subr.mxu0 %v528_v49  ;;  %1463 = vmatpush3.msra.mxu1 %v544_v48  ;;  %v864_v48 = vld [vmem:[%s2278_s4 + $0x30] sm:$0xff]  ;;  %v863_v49 = vld [vmem:[%s2278_s4 + $0x28] sm:$0xff] }
  0x57   : > { %1341 = vmatpush3.msra.mxu0 %v512_v50  ;;  %1464 = vmatprep.subr.mxu1 %v543_v51  ;;  %v862_v50 = vld [vmem:[%s2278_s4 + $0x20] sm:$0xff] }
  0x58   : > { %1342 = vmatprep.subr.mxu0 %v527_v52  ;;  %1465 = vmatpush3.msra.mxu1 %v543_v51  ;;  %v861_v51 = vld [vmem:[%s2278_s4 + $0x18] sm:$0xff]  ;;  %v860_v52 = vld [vmem:[%s2278_s4 + $0x10] sm:$0xff] }
  0x59   : > { %1343 = vmatpush3.msra.mxu0 %v511_v53  ;;  %1466 = vmatprep.subr.mxu1 %v542_v54  ;;  %v859_v53 = vld [vmem:[%s2278_s4 + $0x8] sm:$0xff] }
  0x5a   : > { %1344 = vmatprep.subr.mxu0 %v526_v55  ;;  %1467 = vmatpush3.msra.mxu1 %v542_v54  ;;  %v858_v54 = vld [vmem:[%s2278_s4] sm:$0xff]  ;;  %v1002_v55 = vld [vmem:[%s2280_s6 + $0xf8] sm:$0xff] }
  0x5b   : > { %1345 = vmatpush3.msra.mxu0 %v510_v56  ;;  %1468 = vmatprep.subr.mxu1 %v541_v57  ;;  %v986_v56 = vld [vmem:[%s2280_s6 + $0x78] sm:$0xff] }
  0x5c   : > { %1346 = vmatprep.subr.mxu0 %v525_v58  ;;  %1469 = vmatpush3.msra.mxu1 %v541_v57  ;;  %v2109_v57 = vld [vmem:[%s2280_s6 + $0x178] sm:$0xff]  ;;  %v1001_v58 = vld [vmem:[%s2280_s6 + $0xf0] sm:$0xff] }
  0x5d   : > { %1347 = vmatpush3.msra.mxu0 %v509_v59  ;;  %1470 = vmatprep.subr.mxu1 %v540_v60  ;;  %v985_v59 = vld [vmem:[%s2280_s6 + $0x70] sm:$0xff] }
  0x5e   : > { %1348 = vmatprep.subr.mxu0 %v524_v62  ;;  %1471 = vmatpush3.msra.mxu1 %v540_v60  ;;  %v1000_v60 = vld [vmem:[%s2280_s6 + $0xe8] sm:$0xff] }
  0x5f   : > { %1349 = vmatpush3.msra.mxu0 %v508_v63  ;;  %1472 = vmatprep.subr.mxu1 %v539_v0  ;;  %v984_v62 = vld [vmem:[%s2280_s6 + $0x68] sm:$0xff]  ;;  %v999_v63 = vld [vmem:[%s2280_s6 + $0xe0] sm:$0xff] }
  0x60   : > { %1350 = vmatprep.subr.mxu0 %v523_v1  ;;  %1473 = vmatpush3.msra.mxu1 %v539_v0  ;;  %v983_v0 = vld [vmem:[%s2280_s6 + $0x60] sm:$0xff]  ;;  %v998_v1 = vld [vmem:[%s2280_s6 + $0xd8] sm:$0xff] }
  0x61   : > { %1351 = vmatpush3.msra.mxu0 %v507_v2  ;;  %1474 = vmatprep.subr.mxu1 %v538_v3  ;;  %v982_v2 = vld [vmem:[%s2280_s6 + $0x58] sm:$0xff] }
  0x62   : > { %1352 = vmatprep.subr.mxu0 %v522_v4  ;;  %1475 = vmatpush3.msra.mxu1 %v538_v3  ;;  %v997_v3 = vld [vmem:[%s2280_s6 + $0xd0] sm:$0xff] }
  0x63   : > { %1353 = vmatpush3.msra.mxu0 %v506_v5  ;;  %1476 = vmatprep.subr.mxu1 %v537_v6  ;;  %v981_v4 = vld [vmem:[%s2280_s6 + $0x50] sm:$0xff]  ;;  %v996_v5 = vld [vmem:[%s2280_s6 + $0xc8] sm:$0xff] }
  0x64   : > { %1354 = vmatprep.subr.mxu0 %v521_v7  ;;  %1477 = vmatpush3.msra.mxu1 %v537_v6  ;;  %v980_v6 = vld [vmem:[%s2280_s6 + $0x48] sm:$0xff]  ;;  %v995_v7 = vld [vmem:[%s2280_s6 + $0xc0] sm:$0xff] }
  0x65   : > { %1355 = vmatpush3.msra.mxu0 %v505_v8  ;;  %1478 = vmatprep.subr.mxu1 %v536_v9  ;;  %v979_v8 = vld [vmem:[%s2280_s6 + $0x40] sm:$0xff] }
  0x66   : > { %1356 = vmatprep.subr.mxu0 %v520_v10  ;;  %623 = vmatprep.mubr.f32.mxu0 %v403_v11  ;;  %v978_v10 = vld [vmem:[%s2280_s6 + $0x38] sm:$0xff]  ;;  %v993_v11 = vld [vmem:[%s2280_s6 + $0xb0] sm:$0xff] }
  0x67   : > { %1357 = vmatpush3.msra.mxu0 %v504_v12  ;;  %1479 = vmatpush3.msra.mxu1 %v536_v9  ;;  %v994_v9 = vld [vmem:[%s2280_s6 + $0xb8] sm:$0xff]  ;;  %v977_v12 = vld [vmem:[%s2280_s6 + $0x30] sm:$0xff] }
  0x68   : > { %1358 = vmatprep.subr.mxu0 %v519_v13  ;;  %624 = vmatmul.mubr.f32.gmra.mxu0 %v396_v14 }
  0x69   : > { %1359 = vmatpush3.msra.mxu0 %v503_v15  ;;  %1480 = vmatprep.subr.mxu1 %v535_v16 }
  0x6a   : > { %1360 = vmatprep.subr.mxu0 %v518_v17  ;;  %698 = vmatprep.mubr.f32.mxu1 %v1858_v34  ;;  %v386_v34 = vadd.s32 3, %v344_v19  ;;  %v1244_v19 = vld [vmem:[%s2277_s3] ss:$0 sm:$0xff] }
  0x6b   : > { %1361 = vmatpush3.msra.mxu0 %v502_v18  ;;  %1481 = vmatpush3.msra.mxu1 %v535_v16 }
  0x6c   : > { %1362 = vmatprep.subr.mxu0 %v517_v20  ;;  %699 = vmatmul.mubr.f32.gmra.mxu1 %v410_v21  ;;  %vm390_vm11 = vcmp.lt.s32.totalorder %v386_v34, 16 }
  0x6d   : > { %1363 = vmatpush3.msra.mxu0 %v501_v24  ;;  %1482 = vmatprep.subr.mxu1 %v534_v25 }
  0x6e   : > { %1364 = vmatprep.subr.mxu0 %v516_v26  ;;  %1483 = vmatpush3.msra.mxu1 %v534_v25 }
  0x6f   : > { %1365 = vmatpush3.msra.mxu0 %v500_v29  ;;  %1484 = vmatprep.subr.mxu1 %v533_v30 }
  0x70   : > { %1366 = vmatprep.subr.mxu0 %v515_v35  ;;  %768 = vmatprep.mubr.f32.mxu0 %v424_v36 }
  0x71   : > { %1367 = vmatpush3.msra.mxu0 %v499_v39  ;;  %1485 = vmatpush3.msra.mxu1 %v533_v30 }
  0x72   : > { %769 = vmatmul.mubr.f32.vlgmr.msra.gmra.mxu0 %v417_v40  ;;  %1486 = vmatprep.subr.mxu1 %v532_v41 }
  0x73   : > { %1487 = vmatpush3.msra.mxu1 %v532_v41  ;;  %1248 = vmatprep.mubr.msk.f32.mxu0 %vm382_vm9, %v425_v42 }
  0x74   : > { %1488 = vmatprep.subr.mxu1 %v531_v43  ;;  %1490 = vmatprep.mubr.f32.mxu1 %v431_v44 }
  0x75   : > { %1489 = vmatpush3.msra.mxu1 %v531_v43  ;;  %1493 = vmatprep.subr.mxu0 %v865_v47 }
  0x76   : > { %1249 = vmatmul.mubr.msk.f32.gmra.mxu0 %vm374_vm10, %v418_v46  ;;  %1491 = vmatmul.mubr.msk.f32.vlgmr.msra.gmra.mxu1 %vm390_vm11, %v432_v45 }
  0x77   : > { %1494 = vmatpush3.msra.mxu0 %v865_v47  ;;  %1402 = vmatprep.subr.mxu1 %v1002_v55  ;;  %v1010_v55 = vld [vmem:[%s2280_s6 + $0x138] sm:$0xff] }
  0x78   : > { %1495 = vmatprep.subr.mxu0 %v864_v48  ;;  %1403 = vmatpush3.msra.mxu1 %v986_v56  ;;  %v1009_v56 = vld [vmem:[%s2280_s6 + $0x130] sm:$0xff] }
  0x79   : > { %1496 = vmatpush3.msra.mxu0 %v864_v48  ;;  %1404 = vmatprep.subr.mxu1 %v1001_v58  ;;  %v1017_v48 = vld [vmem:[%s2280_s6 + $0x170] sm:$0xff]  ;;  %v976_v58 = vld [vmem:[%s2280_s6 + $0x28] sm:$0xff] }
  0x7a   : > { %1497 = vmatprep.subr.mxu0 %v863_v49  ;;  %1405 = vmatpush3.msra.mxu1 %v985_v59  ;;  %v1008_v59 = vld [vmem:[%s2280_s6 + $0x128] sm:$0xff] }
  0x7b   : > { %1498 = vmatpush3.msra.mxu0 %v863_v49  ;;  %1406 = vmatprep.subr.mxu1 %v1000_v60  ;;  %v1016_v49 = vld [vmem:[%s2280_s6 + $0x168] sm:$0xff]  ;;  %v991_v60 = vld [vmem:[%s2280_s6 + $0xa0] sm:$0xff] }
  0x7c   : > { %1499 = vmatprep.subr.mxu0 %v862_v50  ;;  %1407 = vmatpush3.msra.mxu1 %v984_v62  ;;  %v975_v62 = vld [vmem:[%s2280_s6 + $0x20] sm:$0xff] }
  0x7d   : > { %1500 = vmatpush3.msra.mxu0 %v862_v50  ;;  %1408 = vmatprep.subr.mxu1 %v999_v63  ;;  %v1015_v50 = vld [vmem:[%s2280_s6 + $0x160] sm:$0xff] }
  0x7e   : > { %1501 = vmatprep.subr.mxu0 %v861_v51  ;;  %1409 = vmatpush3.msra.mxu1 %v983_v0  ;;  %v1007_v63 = vld [vmem:[%s2280_s6 + $0x120] sm:$0xff]  ;;  %v990_v0 = vld [vmem:[%s2280_s6 + $0x98] sm:$0xff] }
  0x7f   : > { %1502 = vmatpush3.msra.mxu0 %v861_v51  ;;  %1410 = vmatprep.subr.mxu1 %v998_v1  ;;  %v1014_v51 = vld [vmem:[%s2280_s6 + $0x158] sm:$0xff] }
  0x80   : > { %1503 = vmatprep.subr.mxu0 %v860_v52  ;;  %1411 = vmatpush3.msra.mxu1 %v982_v2  ;;  %v974_v1 = vld [vmem:[%s2280_s6 + $0x18] sm:$0xff] }
  0x81   : > { %1504 = vmatpush3.msra.mxu0 %v860_v52  ;;  %1412 = vmatprep.subr.mxu1 %v997_v3  ;;  %v1013_v52 = vld [vmem:[%s2280_s6 + $0x150] sm:$0xff]  ;;  %v1006_v2 = vld [vmem:[%s2280_s6 + $0x118] sm:$0xff] }
  0x82   : > { %1505 = vmatprep.subr.mxu0 %v859_v53  ;;  %1413 = vmatpush3.msra.mxu1 %v981_v4  ;;  %v989_v3 = vld [vmem:[%s2280_s6 + $0x90] sm:$0xff] }
  0x83   : > { %1506 = vmatpush3.msra.mxu0 %v859_v53  ;;  %1414 = vmatprep.subr.mxu1 %v996_v5  ;;  %v1012_v53 = vld [vmem:[%s2280_s6 + $0x148] sm:$0xff]  ;;  %v973_v4 = vld [vmem:[%s2280_s6 + $0x10] sm:$0xff] }
  0x84   : > { %1507 = vmatprep.subr.mxu0 %v858_v54  ;;  %1415 = vmatpush3.msra.mxu1 %v980_v6  ;;  %v1005_v5 = vld [vmem:[%s2280_s6 + $0x110] sm:$0xff]  ;;  %v988_v6 = vld [vmem:[%s2280_s6 + $0x88] sm:$0xff] }
  0x85   : > { %1508 = vmatpush3.msra.mxu0 %v858_v54  ;;  %1416 = vmatprep.subr.mxu1 %v995_v7  ;;  %v1011_v54 = vld [vmem:[%s2280_s6 + $0x140] sm:$0xff]  ;;  %v972_v7 = vld [vmem:[%s2280_s6 + $0x8] sm:$0xff] }
  0x86   : > { %1512 = vmatprep.subr.mxu0 %v2109_v57  ;;  %1417 = vmatpush3.msra.mxu1 %v979_v8  ;;  %v1004_v8 = vld [vmem:[%s2280_s6 + $0x108] sm:$0xff] }
  0x87   : > { %1418 = vmatprep.subr.mxu1 %v994_v9  ;;  %v987_v9 = vld [vmem:[%s2280_s6 + $0x80] sm:$0xff] }
  0x88   : > { %1419 = vmatpush3.msra.mxu1 %v978_v10  ;;  %v971_v10 = vld [vmem:[%s2280_s6] sm:$0xff] }
  0x89   : > { %1420 = vmatprep.subr.mxu1 %v993_v11  ;;  %v1003_v11 = vld [vmem:[%s2280_s6 + $0x100] sm:$0xff] }
  0x8a   : > { %1421 = vmatpush3.msra.mxu1 %v977_v12  ;;  %v1251_v12 = vld [vmem:[%s2279_s5] ss:$0 sm:$0xff] }
 0x111   : > { %v1330_v15 = vpop.f32.mrf.mxu1 }
 0x112   : > { %v1292_v13 = vpop.f32.mrf.mxu0 }
 0x113   : > { %v1331_v17 = vpop.f32.mrf.mxu1 }
 0x114   : > { %v1293_v14 = vpop.f32.mrf.mxu0  ;;  %v1332_v23 = vadd.f32 %v1331_v17, %v1330_v15 }
 0x115   : > { %v1294_v18 = vadd.f32 %v1293_v14, %v1292_v13 }
 0x117   : > { %v621_v22 = vadd.f32 %v1294_v18, %v1244_v19 }
 0x119   : > { %v696_v28 = vadd.f32 %v1332_v23, %v621_v22 }
 0x128   : > { %v1295_v16 = vpop.f32.mrf.mxu0 }
 0x12a   : > { %v1296_v20 = vpop.f32.mrf.mxu0 }
 0x12b   : > { %v1297_v24 = vadd.f32 %v1296_v20, %v1295_v16 }
 0x12c   : > { %v1333_v21 = vpop.f32.mrf.mxu1 }
 0x12d   : > { %v626_v29 = vadd.f32 %v1297_v24, %v1244_v19 }
 0x12e   : > { %v1334_v25 = vpop.f32.mrf.mxu1 }
 0x12f   : > { %v1335_v30 = vadd.f32 %v1334_v25, %v1333_v21 }
 0x131   : > { %v701_v40 = vadd.f32 %v1335_v30, %v626_v29 }
 0x132   : > { %v1368_v26 = vpop.f32.mrf.mxu0 }
 0x134   : > { %v1369_v27 = vpop.f32.mrf.mxu0 }
 0x135   : > { %v1370_v33 = vadd.f32 %v1369_v27, %v1368_v26 }
 0x136   : > { %v1371_v35 = vpop.f32.mrf.mxu0  ;;  %v1492_v36 = vpop.f32.mrf.mxu1 }
 0x137   : > { %v771_v37 = vadd.f32 %v1370_v33, %v696_v28 }
 0x138   : > { %v1372_v38 = vpop.f32.mrf.mxu0  ;;  %v845_v39 = vpop.f32.mrf.mxu1 }
 0x139   : > { %v1373_v41 = vadd.f32 %v1372_v38, %v1371_v35  ;;  %v846_v34 = vadd.f32 %v845_v39, %v771_v37  ;;  %v1020_v35 = vstv %s1019_s10 }
 0x13b   : > { %v776_v42 = vadd.f32 %v1373_v41, %v701_v40  ;;  %v854_v43 = vmul.f32 0.2, %v846_v34 }
 0x13d   : > { %v851_v44 = vadd.f32 %v1492_v36, %v776_v42  ;;  %v856_v45 = vmax.f32 %v846_v34, %v854_v43 }
 0x13f   : > { %v855_v46 = vmul.f32 0.2, %v851_v44  ;;  %1509 = vmatprep.mubr.msk.f32.mxu0 %vm873_vm12, %v856_v45 }
 0x141   : > { %v857_v47 = vmax.f32 %v851_v44, %v855_v46 }
 0x143   : > { %1510 = vmatmul.mubr.msk.f32.vlgmr.msra.gmra.mxu0 %vm873_vm12, %v857_v47 }
 0x144   : > { %1513 = vmatpush3.msra.mxu0 %v2109_v57  ;;  %v992_v57 = vld [vmem:[%s2280_s6 + $0xa8] sm:$0xff] }
 0x145   : > { %1514 = vmatprep.subr.mxu0 %v1017_v48  ;;  %1422 = vmatprep.subr.mxu1 %v992_v57 }
 0x146   : > { %1515 = vmatpush3.msra.mxu0 %v1017_v48  ;;  %1423 = vmatpush3.msra.mxu1 %v976_v58 }
 0x147   : > { %1516 = vmatprep.subr.mxu0 %v1016_v49  ;;  %1424 = vmatprep.subr.mxu1 %v991_v60 }
 0x148   : > { %1517 = vmatpush3.msra.mxu0 %v1016_v49  ;;  %1425 = vmatpush3.msra.mxu1 %v975_v62 }
 0x149   : > { %1518 = vmatprep.subr.mxu0 %v1015_v50  ;;  %1426 = vmatprep.subr.mxu1 %v990_v0 }
 0x14a   : > { %1519 = vmatpush3.msra.mxu0 %v1015_v50  ;;  %1427 = vmatpush3.msra.mxu1 %v974_v1 }
 0x14b   : > { %1520 = vmatprep.subr.mxu0 %v1014_v51  ;;  %1428 = vmatprep.subr.mxu1 %v989_v3 }
 0x14c   : > { %1521 = vmatpush3.msra.mxu0 %v1014_v51  ;;  %1429 = vmatpush3.msra.mxu1 %v973_v4 }
 0x14d   : > { %1522 = vmatprep.subr.mxu0 %v1013_v52  ;;  %1430 = vmatprep.subr.mxu1 %v988_v6 }
 0x14e   : > { %1523 = vmatpush3.msra.mxu0 %v1013_v52  ;;  %1431 = vmatpush3.msra.mxu1 %v972_v7 }
 0x14f   : > { %1524 = vmatprep.subr.mxu0 %v1012_v53  ;;  %1432 = vmatprep.subr.mxu1 %v987_v9 }
 0x150   : > { %1525 = vmatpush3.msra.mxu0 %v1012_v53  ;;  %1433 = vmatpush3.msra.mxu1 %v971_v10 }
 0x151   : > { %1526 = vmatprep.subr.mxu0 %v1011_v54 }
 0x152   : > { %1527 = vmatpush3.msra.mxu0 %v1011_v54 }
 0x153   : > { %1528 = vmatprep.subr.mxu0 %v1010_v55 }
 0x154   : > { %1529 = vmatpush3.msra.mxu0 %v1010_v55 }
 0x155   : > { %1530 = vmatprep.subr.mxu0 %v1009_v56 }
 0x156   : > { %1531 = vmatpush3.msra.mxu0 %v1009_v56 }
 0x157   : > { %1532 = vmatprep.subr.mxu0 %v1008_v59 }
 0x158   : > { %1533 = vmatpush3.msra.mxu0 %v1008_v59 }
 0x159   : > { %1534 = vmatprep.subr.mxu0 %v1007_v63 }
 0x15a   : > { %1535 = vmatpush3.msra.mxu0 %v1007_v63 }
 0x15b   : > { %1536 = vmatprep.subr.mxu0 %v1006_v2 }
 0x15c   : > { %1537 = vmatpush3.msra.mxu0 %v1006_v2 }
 0x15d   : > { %1538 = vmatprep.subr.mxu0 %v1005_v5 }
 0x15e   : > { %1539 = vmatpush3.msra.mxu0 %v1005_v5 }
 0x15f   : > { %1540 = vmatprep.subr.mxu0 %v1004_v8 }
 0x160   : > { %1541 = vmatpush3.msra.mxu0 %v1004_v8 }
 0x161   : > { %1542 = vmatprep.subr.mxu0 %v1003_v11 }
 0x162   : > { %1543 = vmatpush3.msra.mxu0 %v1003_v11 }
 0x203   : > { %v1511_v13 = vpop.f32.mrf.mxu0 }
 0x204   : > { %v952_v14 = vadd.f32 %v1511_v13, %v1251_v12 }
 0x205   : > { %v946_v15 = vpop.f32.mrf.mxu0 }
 0x206   : > { %v956_v16 = vmul.f32 0.2, %v952_v14  ;;  %v947_v17 = vadd.f32 %v1251_v12, %v946_v15 }
 0x208   : > { %v958_v18 = vmax.f32 %v952_v14, %v956_v16  ;;  %v955_v19 = vmul.f32 0.2, %v947_v17 }
 0x20a   : > { %v957_v20 = vmax.f32 %v947_v17, %v955_v19  ;;  %v960_v21 = vrot.slane %v958_v18, 7  ;;  %v966_v24 = vrot.slane %v958_v18, 1 }
 0x20c   : > { %v959_v22 = vrot.slane %v957_v20, 7  ;;  %1085 = vmatprep.mubr.f32.mxu1 %v957_v20  ;;  %v965_v23 = vrot.slane %v957_v20, 1 }
 0x20e   : > { %v962_v25 = vsel %vm409_vm3, %v960_v21, %v959_v22  ;;  %v967_v26 = vsel %vm416_vm7, %v965_v23, %v966_v24  ;;  %v968_v27 = vsel %vm416_vm7, %v966_v24, %v965_v23  ;;  %v961_v28 = vsel %vm409_vm3, %v959_v22, %v960_v21 }
 0x20f   : > { %1254 = vmatmul.mubr.msk.f32.vlgmr.msra.gmra.mxu1 %vm363_vm4, %v962_v25  ;;  %1544 = vmatprep.mubr.f32.mxu0 %v967_v26 }
 0x210   : > { %1090 = vmatprep.mubr.f32.mxu1 %v958_v18  ;;  %1545 = vmatmul.mubr.msk.f32.vlgmr.msra.gmra.mxu0 %vm374_vm10, %v968_v27 }
 0x213   : > { %1091 = vmatmul.mubr.f32.gmra.mxu1 %v961_v28 }
 0x2cf   : > { %v1434_v29 = vpop.f32.mrf.mxu1 }
 0x2d0   : > { %v1546_v30 = vpop.f32.mrf.mxu0 }
 0x2d1   : > { %v1435_v33 = vpop.f32.mrf.mxu1 }
 0x2d2   : > { %v1436_v36 = vadd.f32 %v1435_v33, %v1434_v29  ;;  %v1162_v31 = vpop.f32.mrf.mxu0 }
 0x2d3   : > { %v1437_v37 = vpop.f32.mrf.mxu1 }
 0x2d4   : > { %v1088_v38 = vadd.f32 %v1436_v36, %v1020_v35 }
 0x2d5   : > { %v1438_v39 = vpop.f32.mrf.mxu1 }
 0x2d6   : > { %v1163_v40 = vadd.f32 %v1162_v31, %v1088_v38  ;;  %v1439_v41 = vadd.f32 %v1438_v39, %v1437_v37 }
 0x2d8   : > { %1561 = vtanh.f32 %v1163_v40  ;;  %v1093_v32 = vadd.f32 %v1439_v41, %v1020_v35 }
 0x2da   : > { %v1168_v34 = vadd.f32 %v1546_v30, %v1093_v32 }
 0x2dc   : > { %1563 = vtanh.f32 %v1168_v34 }
 0x2e5   : > { %v1562_v61 = vpop.eup %1561 }
 0x2e6   : > { %1174 = vst.msk [vmem:[%s306_s12] sm:$0xff] %vm1173_vm13, %v1562_v61 }
 0x2e9   : > { %v1564_v42 = vpop.eup %1563 }
 0x2ea   : > { %1175 = vst.msk [vmem:[%s306_s12 + $0x8] sm:$0xff] %vm1173_vm13, %v1564_v42 }
 0x2eb PF: > { %s19_s29 = sadd.s32 1, %s1571_s29  }
 0x2ec   : > { %p16_p4 = scmp.ge.s32.totalorder %s19_s29, 4  }
 0x2ee   :  { %18 = sbr.rel (!%p16_p4) target bundleno = 2 (0x2), region = 82 }

</bundles_post_ra>
